<compile_context>
chip_gen: v7x
topology: tpu7x:2x2x1
jax: 0.10.0
libtpu: 0.0.40
codegen_flags: <defaults>
</compile_context>

<pallas_src>
import jax
import jax.numpy as jnp
from jax.experimental import pallas as pl
from jax.experimental.pallas import tpu as pltpu


# ----------------------------------------------------------------------------
# Pallas kernel: fused, row-tiled mask expansion.
# For each token (row of the tile) produce an int8 validity mask
#   mdx[t, c] = (c < valid_len[t]).
# This is the only per-element compute the module needs from a kernel: ddx is
# the zero-padded packed slab and pos is shape-only metadata (wrapper-side).
# ----------------------------------------------------------------------------
def _mask_kernel(valid_ref, mdx_ref):
    # valid_ref: [TR, 1]         int32 (number of real weights in each token)
    # mdx_ref:   [TR, tokensize] int8
    col = jax.lax.broadcasted_iota(jnp.int32, mdx_ref.shape, 1)
    mdx_ref[...] = (col < valid_ref[...]).astype(jnp.int8)


def _tokenize_mask(valid_len, tokensize, tile_rows=512):
    """Expand per-token valid lengths [N] into an int8 mask [N, tokensize]."""
    n = valid_len.shape[0]
    tr = tile_rows                            # multiple of 32 (int8 packing)
    n_pad = pl.cdiv(n, tr) * tr
    # Tail tokens get valid_len = 0 -> fully masked; sliced off below.
    valid2 = jnp.pad(valid_len.astype(jnp.int32), (0, n_pad - n))[:, None]

    mdx = pl.pallas_call(
        _mask_kernel,
        grid=(n_pad // tr,),
        in_specs=[pl.BlockSpec((tr, 1), lambda i: (i, 0))],
        out_specs=pl.BlockSpec((tr, tokensize), lambda i: (i, 0)),
        out_shape=jax.ShapeDtypeStruct((n_pad, tokensize), jnp.int8),
        compiler_params=pltpu.CompilerParams(
            dimension_semantics=("parallel",)),   # v7x: shard tiles over 2 TCs
    )(valid2)
    return mdx[:n]


# ----------------------------------------------------------------------------
# tokenize_checkpoint + TokenizerAugmentation (forward-pass equivalent)
# ----------------------------------------------------------------------------
def _flatten_2d(w):
    w = jnp.asarray(w, jnp.float32)
    if w.ndim == 0:
        return w.reshape(1, 1)
    if w.ndim == 1:
        return w[:, None]
    return w.reshape(w.shape[0], -1)


def tokenize_checkpoint(checkpoint, tokensize, return_mask=True, ignore_bn=False):
    # TODO(synk): per-layer ragged flatten/pad/concat is inherently non-uniform;
    # it stays as trace-time jnp data movement (no clean single-grid Pallas form).
    ddx_l, valid_l, pos_l = [], [], []
    for layer_idx, (key, w) in enumerate(checkpoint.items()):
        if ignore_bn and any(s in key for s in ("bn", "batchnorm", "downsample.1")):
            continue
        w2d = _flatten_2d(w)
        r, c = w2d.shape
        t = pl.cdiv(c, tokensize)
        cpad = t * tokensize

        # Token slab for this layer: zero-pad fan-in, split rows into tokens.
        # (the zero-padded slab IS ddx for this layer — no kernel copy needed)
        ddx_l.append(jnp.pad(w2d, ((0, 0), (0, cpad - c))).reshape(r * t, tokensize))

        # Per-token number of real weights (dense metadata driving the kernel).
        v_row = jnp.clip(c - jnp.arange(t, dtype=jnp.int32) * tokensize, 0, tokensize)
        valid_l.append(jnp.broadcast_to(v_row[None, :], (r, t)).reshape(-1))

        # Positions [layer, row (neuron/channel), token-within-row]: shape-only,
        # built with jnp iota in the wrapper (kept out of the kernel — the [*,3]
        # stores would be maximally lane-sparse).
        lay = jnp.full((r * t,), layer_idx, dtype=jnp.int32)
        row = jnp.broadcast_to(jnp.arange(r, dtype=jnp.int32)[:, None], (r, t)).reshape(-1)
        tok = jnp.broadcast_to(jnp.arange(t, dtype=jnp.int32)[None, :], (r, t)).reshape(-1)
        pos_l.append(jnp.stack([lay, row, tok], axis=1))

    ddx = jnp.concatenate(ddx_l, axis=0)          # [N, tokensize] f32, zero-padded
    valid = jnp.concatenate(valid_l, axis=0)      # [N] int32
    pos = jnp.concatenate(pos_l, axis=0)          # [N, 3] int32

    # Single fused, row-tiled Pallas kernel over all layers' tokens.
    mdx_i8 = _tokenize_mask(valid, tokensize)
    mdx = mdx_i8.astype(jnp.bool_)                # 1-byte convert, keeps bool API

    if return_mask:
        return ddx, mdx, pos
    return ddx, pos


class TokenizerAugmentation:
    """Pallas-backed equivalent of the PyTorch TokenizerAugmentation module."""

    def __init__(self, tokensize, ignore_bn=False):
        self.tokensize = tokensize
        self.ignore_bn = ignore_bn

    def __call__(self, checkpoint):
        ddx, mdx, pos = tokenize_checkpoint(
            checkpoint, self.tokensize, return_mask=True, ignore_bn=self.ignore_bn)
        return (ddx, mdx, pos)


# ----------------------------------------------------------------------------
# main
# ----------------------------------------------------------------------------
if __name__ == "__main__":
    key = jax.random.PRNGKey(0)
    k1, k2, k3, k4 = jax.random.split(key, 4)

    # Small, deterministic synthetic "checkpoint" (conv + bn + fc).
    checkpoint = {
        "conv1.weight": jax.random.normal(k1, (4, 3, 3, 3), dtype=jnp.float32),
        "conv1.bias":   jax.random.normal(k2, (4,), dtype=jnp.float32),
        "bn1.weight":   jnp.ones((4,), dtype=jnp.float32),
        "bn1.bias":     jnp.zeros((4,), dtype=jnp.float32),
        "fc.weight":    jax.random.normal(k3, (8, 36), dtype=jnp.float32),
        "fc.bias":      jax.random.normal(k4, (8,), dtype=jnp.float32),
    }

    tokensize = 16
    aug = TokenizerAugmentation(tokensize=tokensize, ignore_bn=False)
    ddx, mdx, pos = aug(checkpoint)
    jax.block_until_ready((ddx, mdx, pos))

    # ---- sanity checks ------------------------------------------------------
    n_params = sum(int(jnp.size(v)) for v in checkpoint.values())
    exp_tokens = 0
    for v in checkpoint.values():
        w2d = _flatten_2d(v)
        exp_tokens += w2d.shape[0] * ((w2d.shape[1] + tokensize - 1) // tokensize)

    assert ddx.shape == (exp_tokens, tokensize) and mdx.shape == ddx.shape
    assert pos.shape == (exp_tokens, 3)
    assert mdx.dtype == jnp.bool_
    assert int(mdx.sum()) == n_params                        # mask covers every real weight
    assert bool(jnp.all(jnp.where(mdx, 0.0, ddx) == 0.0))    # padding is exactly zero
    # Masked-select of ddx reproduces the original weights in row-major order.
    expected_flat = jnp.concatenate(
        [jnp.asarray(v, jnp.float32).reshape(-1) for v in checkpoint.values()])
    assert bool(jnp.allclose(ddx[mdx], expected_flat))
    assert int(pos[:, 0].max()) == len(checkpoint) - 1

    # Also exercise the ignore_bn path once (bn layers dropped, indices kept).
    ddx_nb, mdx_nb, pos_nb = TokenizerAugmentation(tokensize, ignore_bn=True)(checkpoint)
    jax.block_until_ready((ddx_nb, mdx_nb, pos_nb))
    assert int(mdx_nb.sum()) == n_params - 8                 # 2 bn tensors of 4 params
    assert set(map(int, jnp.unique(pos_nb[:, 0]))) == {0, 1, 4, 5}

    print("KERNEL_OK")
</pallas_src>

<mosaic_0001>
module attributes {stable_mosaic.version = 11 : i64} {
  func.func @_mask_kernel(%arg0: i32, %arg1: memref<512x1xi32, #tpu.memory_space<vmem>>, %arg2: memref<512x16xi8, #tpu.memory_space<vmem>>) attributes {dimension_semantics = [#tpu.dimension_semantics<parallel>], iteration_bounds = array<i64: 1>, scalar_prefetch = 0 : i64, scratch_operands = 0 : i64, tpu.core_type = #tpu.core_type<tc>, window_params = [{transform_indices = @transform_0, window_bounds = array<i64: 512, 1>}, {transform_indices = @transform_1, window_bounds = array<i64: 512, 16>}]} {
    %0 = tpu.iota {dimensions = array<i32: 1>} : vector<512x16xi32>
    %c0 = arith.constant 0 : index
    %c0_0 = arith.constant 0 : index
    %1 = vector.load %arg1[%c0, %c0_0] : memref<512x1xi32, #tpu.memory_space<vmem>>, vector<512x1xi32>
    %2 = vector.broadcast %1 : vector<512x1xi32> to vector<512x16xi32>
    %3 = arith.cmpi slt, %0, %2 : vector<512x16xi32>
    %4 = arith.extui %3 : vector<512x16xi1> to vector<512x16xi8>
    %c0_1 = arith.constant 0 : index
    %c0_2 = arith.constant 0 : index
    %5 = vector.load %arg2[%c0_1, %c0_2] : memref<512x16xi8, #tpu.memory_space<vmem>>, vector<512x16xi8>
    tpu.vector_store %arg2[%c0_1, %c0_2], %4 {strides = array<i32>} : memref<512x16xi8, #tpu.memory_space<vmem>>, vector<512x16xi8>,
    return
  }
  func.func @transform_0(%arg0: i32) -> (i32, i32) {
    %c0_i32 = arith.constant 0 : i32
    %c0_i32_0 = arith.constant 0 : i32
    return %arg0, %c0_i32 : i32, i32
  }
  func.func @transform_1(%arg0: i32) -> (i32, i32) {
    %c0_i32 = arith.constant 0 : i32
    %c0_i32_0 = arith.constant 0 : i32
    return %arg0, %c0_i32 : i32, i32
  }
}

</mosaic_0001>

<bundles_post_ra>
// kernel: tpu_custom_call.1
= control target key start
LH: loop header
LB: loop body
LE: loop exit
PB: predicated region body
PF: predicated region fallthrough
CT: control target
= control target key end

     0   :  { %v660_v0 = vmov 0   ;;  %vm588_vm9 = vcmask 123904   ;;  %s1203_s0 = inlined_call_operand.vmem [shape: s32[512,1], index: 0, kind: input, shape index: {}]   ;;  %s1204_s1 = inlined_call_operand.vmem [shape: s8[512,16], index: 1, kind: output, shape index: {}]  }
   0x1   :  { %659 = vset.pattern.permute.xlu1 %v660_v0  ;;  %658 = vset.pattern.permute.xlu0 %v660_v0  ;;  %v14_v1 = vld [vmem:[%s1203_s0 + $0x10] sm:$0xff]  ;;  %v12_v2 = vld [vmem:[%s1203_s0] sm:$0xff]  ;;  %v15_v3 = vld [vmem:[%s1203_s0 + $0x18] sm:$0xff] }
   0x2   :  { %83 = vperm.xlu1 %659, %v14_v1   ;;  %77 = vperm.xlu0 %658, %v12_v2   ;;  %v13_v4 = vld [vmem:[%s1203_s0 + $0x8] sm:$0xff]  ;;  %v16_v6 = vld [vmem:[%s1203_s0 + $0x20] sm:$0xff]  ;;  %v19_v7 = vld [vmem:[%s1203_s0 + $0x38] sm:$0xff]  ;;  %v10_v2 = vlaneseq }
   0x3   :  { %v17_v5 = vld [vmem:[%s1203_s0 + $0x28] sm:$0xff]  ;;  %v18_v8 = vld [vmem:[%s1203_s0 + $0x30] sm:$0xff]  ;;  %v20_v10 = vld [vmem:[%s1203_s0 + $0x40] sm:$0xff] }
   0x4   :  { %v21_v9 = vld [vmem:[%s1203_s0 + $0x48] sm:$0xff]  ;;  %v23_v11 = vld [vmem:[%s1203_s0 + $0x58] sm:$0xff]  ;;  %v22_v12 = vld [vmem:[%s1203_s0 + $0x50] sm:$0xff] }
   0x5   :  { %v25_v13 = vld [vmem:[%s1203_s0 + $0x68] sm:$0xff]  ;;  %v24_v14 = vld [vmem:[%s1203_s0 + $0x60] sm:$0xff]  ;;  %v27_v15 = vld [vmem:[%s1203_s0 + $0x78] sm:$0xff] }
   0x6   :  { %86 = vperm.xlu1 %659, %v15_v3   ;;  %80 = vperm.xlu0 %658, %v13_v4   ;;  %v26_v16 = vld [vmem:[%s1203_s0 + $0x70] sm:$0xff]  ;;  %v29_v17 = vld [vmem:[%s1203_s0 + $0x88] sm:$0xff]  ;;  %v28_v18 = vld [vmem:[%s1203_s0 + $0x80] sm:$0xff] }
   0x7   :  { %v31_v19 = vld [vmem:[%s1203_s0 + $0x98] sm:$0xff]  ;;  %v30_v20 = vld [vmem:[%s1203_s0 + $0x90] sm:$0xff]  ;;  %v33_v21 = vld [vmem:[%s1203_s0 + $0xa8] sm:$0xff] }
   0x8   :  { %v32_v22 = vld [vmem:[%s1203_s0 + $0xa0] sm:$0xff]  ;;  %v35_v23 = vld [vmem:[%s1203_s0 + $0xb8] sm:$0xff]  ;;  %v34_v24 = vld [vmem:[%s1203_s0 + $0xb0] sm:$0xff] }
   0x9   :  { %v37_v25 = vld [vmem:[%s1203_s0 + $0xc8] sm:$0xff]  ;;  %v36_v26 = vld [vmem:[%s1203_s0 + $0xc0] sm:$0xff]  ;;  %v39_v27 = vld [vmem:[%s1203_s0 + $0xd8] sm:$0xff] }
   0xa   :  { %92 = vperm.xlu1 %659, %v17_v5   ;;  %89 = vperm.xlu0 %658, %v16_v6   ;;  %v38_v28 = vld [vmem:[%s1203_s0 + $0xd0] sm:$0xff]  ;;  %v41_v29 = vld [vmem:[%s1203_s0 + $0xe8] sm:$0xff]  ;;  %v40_v30 = vld [vmem:[%s1203_s0 + $0xe0] sm:$0xff]  ;;  %v865_v5 = vand.u32 127, %v10_v2 }
   0xb   :  { %v43_v31 = vld [vmem:[%s1203_s0 + $0xf8] sm:$0xff]  ;;  %v42_v32 = vld [vmem:[%s1203_s0 + $0xf0] sm:$0xff]  ;;  %v45_v33 = vld [vmem:[%s1203_s0 + $0x108] sm:$0xff] }
   0xc   :  { %v44_v34 = vld [vmem:[%s1203_s0 + $0x100] sm:$0xff]  ;;  %v47_v35 = vld [vmem:[%s1203_s0 + $0x118] sm:$0xff]  ;;  %v46_v36 = vld [vmem:[%s1203_s0 + $0x110] sm:$0xff] }
   0xd   :  { %v49_v37 = vld [vmem:[%s1203_s0 + $0x128] sm:$0xff]  ;;  %v48_v38 = vld [vmem:[%s1203_s0 + $0x120] sm:$0xff]  ;;  %v51_v39 = vld [vmem:[%s1203_s0 + $0x138] sm:$0xff] }
   0xe   :  { %98 = vperm.xlu1 %659, %v19_v7   ;;  %95 = vperm.xlu0 %658, %v18_v8   ;;  %v50_v40 = vld [vmem:[%s1203_s0 + $0x130] sm:$0xff]  ;;  %v53_v41 = vld [vmem:[%s1203_s0 + $0x148] sm:$0xff]  ;;  %v52_v42 = vld [vmem:[%s1203_s0 + $0x140] sm:$0xff] }
   0xf   :  { %v55_v43 = vld [vmem:[%s1203_s0 + $0x158] sm:$0xff]  ;;  %v54_v44 = vld [vmem:[%s1203_s0 + $0x150] sm:$0xff]  ;;  %v57_v45 = vld [vmem:[%s1203_s0 + $0x168] sm:$0xff] }
  0x10   :  { %v56_v46 = vld [vmem:[%s1203_s0 + $0x160] sm:$0xff]  ;;  %v59_v47 = vld [vmem:[%s1203_s0 + $0x178] sm:$0xff]  ;;  %v58_v48 = vld [vmem:[%s1203_s0 + $0x170] sm:$0xff] }
  0x11   :  { %v61_v49 = vld [vmem:[%s1203_s0 + $0x188] sm:$0xff]  ;;  %v60_v50 = vld [vmem:[%s1203_s0 + $0x180] sm:$0xff]  ;;  %v63_v51 = vld [vmem:[%s1203_s0 + $0x198] sm:$0xff] }
  0x12   :  { %104 = vperm.xlu1 %659, %v21_v9   ;;  %101 = vperm.xlu0 %658, %v20_v10   ;;  %v62_v52 = vld [vmem:[%s1203_s0 + $0x190] sm:$0xff]  ;;  %v65_v53 = vld [vmem:[%s1203_s0 + $0x1a8] sm:$0xff]  ;;  %v64_v54 = vld [vmem:[%s1203_s0 + $0x1a0] sm:$0xff] }
  0x13   :  { %v67_v55 = vld [vmem:[%s1203_s0 + $0x1b8] sm:$0xff]  ;;  %v66_v56 = vld [vmem:[%s1203_s0 + $0x1b0] sm:$0xff]  ;;  %v69_v57 = vld [vmem:[%s1203_s0 + $0x1c8] sm:$0xff] }
  0x14   :  { %v68_v58 = vld [vmem:[%s1203_s0 + $0x1c0] sm:$0xff]  ;;  %v71_v59 = vld [vmem:[%s1203_s0 + $0x1d8] sm:$0xff]  ;;  %v70_v60 = vld [vmem:[%s1203_s0 + $0x1d0] sm:$0xff] }
  0x15   :  { %v73_v61 = vld [vmem:[%s1203_s0 + $0x1e8] sm:$0xff]  ;;  %v72_v62 = vld [vmem:[%s1203_s0 + $0x1e0] sm:$0xff]  ;;  %v75_v63 = vld [vmem:[%s1203_s0 + $0x1f8] sm:$0xff] }
  0x16   :  { %110 = vperm.xlu1 %659, %v23_v11   ;;  %107 = vperm.xlu0 %658, %v22_v12   ;;  %v74_v1 = vld [vmem:[%s1203_s0 + $0x1f0] sm:$0xff] }
  0x1a   :  { %116 = vperm.xlu1 %659, %v25_v13   ;;  %113 = vperm.xlu0 %658, %v24_v14  }
  0x1e   :  { %122 = vperm.xlu1 %659, %v27_v15   ;;  %119 = vperm.xlu0 %658, %v26_v16  }
  0x22   :  { %128 = vperm.xlu1 %659, %v29_v17   ;;  %125 = vperm.xlu0 %658, %v28_v18  }
  0x26   :  { %134 = vperm.xlu1 %659, %v31_v19   ;;  %131 = vperm.xlu0 %658, %v30_v20  }
  0x2a   :  { %140 = vperm.xlu1 %659, %v33_v21   ;;  %137 = vperm.xlu0 %658, %v32_v22  }
  0x2e   :  { %146 = vperm.xlu1 %659, %v35_v23   ;;  %143 = vperm.xlu0 %658, %v34_v24  }
  0x32   :  { %152 = vperm.xlu1 %659, %v37_v25   ;;  %149 = vperm.xlu0 %658, %v36_v26  }
  0x36   :  { %158 = vperm.xlu1 %659, %v39_v27   ;;  %155 = vperm.xlu0 %658, %v38_v28  }
  0x3a   :  { %164 = vperm.xlu1 %659, %v41_v29   ;;  %161 = vperm.xlu0 %658, %v40_v30  }
  0x3e   :  { %170 = vperm.xlu1 %659, %v43_v31   ;;  %167 = vperm.xlu0 %658, %v42_v32  }
  0x42   :  { %176 = vperm.xlu1 %659, %v45_v33   ;;  %173 = vperm.xlu0 %658, %v44_v34  }
  0x46   :  { %182 = vperm.xlu1 %659, %v47_v35   ;;  %179 = vperm.xlu0 %658, %v46_v36  }
  0x4a   :  { %188 = vperm.xlu1 %659, %v49_v37   ;;  %185 = vperm.xlu0 %658, %v48_v38  }
  0x4e   :  { %194 = vperm.xlu1 %659, %v51_v39   ;;  %191 = vperm.xlu0 %658, %v50_v40  }
  0x52   :  { %200 = vperm.xlu1 %659, %v53_v41   ;;  %197 = vperm.xlu0 %658, %v52_v42  }
  0x56   :  { %206 = vperm.xlu1 %659, %v55_v43   ;;  %203 = vperm.xlu0 %658, %v54_v44  }
  0x5a   :  { %212 = vperm.xlu1 %659, %v57_v45   ;;  %209 = vperm.xlu0 %658, %v56_v46  }
  0x5e   :  { %218 = vperm.xlu1 %659, %v59_v47   ;;  %215 = vperm.xlu0 %658, %v58_v48  }
  0x62   :  { %224 = vperm.xlu1 %659, %v61_v49   ;;  %221 = vperm.xlu0 %658, %v60_v50  }
  0x66   :  { %230 = vperm.xlu1 %659, %v63_v51   ;;  %227 = vperm.xlu0 %658, %v62_v52  }
  0x6a   :  { %236 = vperm.xlu1 %659, %v65_v53   ;;  %233 = vperm.xlu0 %658, %v64_v54  }
  0x6e   :  { %242 = vperm.xlu1 %659, %v67_v55   ;;  %239 = vperm.xlu0 %658, %v66_v56  }
  0x72   :  { %248 = vperm.xlu1 %659, %v69_v57   ;;  %245 = vperm.xlu0 %658, %v68_v58  }
  0x76   :  { %254 = vperm.xlu1 %659, %v71_v59   ;;  %251 = vperm.xlu0 %658, %v70_v60  }
  0x7a   :  { %260 = vperm.xlu1 %659, %v73_v61   ;;  %257 = vperm.xlu0 %658, %v72_v62  }
  0x7e   :  { %266 = vperm.xlu1 %659, %v75_v63   ;;  %263 = vperm.xlu0 %658, %v74_v1  }
  0x81   :  { %v84_v3 = vpop.permute.xlu1 %83  ;;  %v78_v4 = vpop.permute.xlu0 %77 }
  0x82   :  { %vm270_vm0 = vcmp.lt.s32.totalorder %v865_v5, %v84_v3  ;;  %vm268_vm3 = vcmp.lt.s32.totalorder %v865_v5, %v78_v4 }
  0x85   :  { %v87_v6 = vpop.permute.xlu1 %86  ;;  %v81_v7 = vpop.permute.xlu0 %80 }
  0x86   :  { %vm271_vm1 = vcmp.lt.s32.totalorder %v865_v5, %v87_v6  ;;  %vm269_vm2 = vcmp.lt.s32.totalorder %v865_v5, %v81_v7 }
  0x87   :  { %vm333_vm4 = vmpackc.low %vm271_vm1, %vm270_vm0 }
  0x88   :  { %vm332_vm5 = vmpackc.low %vm269_vm2, %vm268_vm3 }
  0x89   :  { %vm334_vm6 = vmpackc.even %vm333_vm4, %vm332_vm5  ;;  %v93_v8 = vpop.permute.xlu1 %92  ;;  %v90_v9 = vpop.permute.xlu0 %89 }
  0x8a   :  { %v380_v10 = vsel %vm334_vm6, 16843009, %v660_v0  ;;  %vm273_vm7 = vcmp.lt.s32.totalorder %v865_v5, %v93_v8  ;;  %vm272_vm8 = vcmp.lt.s32.totalorder %v865_v5, %v90_v9 }
  0x8b   :  { %v396_v11 = vunpack.c.0.s8 %v380_v10  ;;  %v397_v12 = vunpack.c.1.s8 %v380_v10  ;;  %v398_v13 = vunpack.c.2.s8 %v380_v10  ;;  %v399_v14 = vunpack.c.3.s8 %v380_v10  ;;  %vm335_vm10 = vmpackc.low %vm273_vm7, %vm272_vm8 }
  0x8d   :  { %v460_v15 = vpack.c.b16 %v396_v11, %v396_v11  ;;  %v462_v16 = vpack.c.b16 %v397_v12, %v397_v12  ;;  %v464_v17 = vpack.c.b16 %v398_v13, %v398_v13  ;;  %v466_v18 = vpack.c.b16 %v399_v14, %v399_v14  ;;  %v99_v19 = vpop.permute.xlu1 %98  ;;  %v96_v20 = vpop.permute.xlu0 %95 }
  0x8e   :  { %vm275_vm11 = vcmp.lt.s32.totalorder %v865_v5, %v99_v19  ;;  %vm274_vm12 = vcmp.lt.s32.totalorder %v865_v5, %v96_v20 }
  0x8f   :  { %v461_v21 = vpack.c.b8 %v460_v15, %v460_v15  ;;  %v463_v22 = vpack.c.b8 %v462_v16, %v462_v16  ;;  %v465_v23 = vpack.c.b8 %v464_v17, %v464_v17  ;;  %v467_v24 = vpack.c.b8 %v466_v18, %v466_v18  ;;  %vm336_vm13 = vmpackc.low %vm275_vm11, %vm274_vm12 }
  0x90   :  { %vm337_vm14 = vmpackc.even %vm336_vm13, %vm335_vm10 }
  0x91   :  { %589 = vst.msk [vmem:[%s1204_s1] sm:$0x3] %vm588_vm9, %v461_v21  ;;  %590 = vst.msk [vmem:[%s1204_s1 + $0x2] sm:$0x3] %vm588_vm9, %v463_v22  ;;  %v381_v25 = vsel %vm337_vm14, 16843009, %v660_v0  ;;  %v105_v26 = vpop.permute.xlu1 %104  ;;  %v102_v27 = vpop.permute.xlu0 %101 }
  0x92   :  { %591 = vst.msk [vmem:[%s1204_s1 + $0x4] sm:$0x3] %vm588_vm9, %v465_v23  ;;  %592 = vst.msk [vmem:[%s1204_s1 + $0x6] sm:$0x3] %vm588_vm9, %v467_v24  ;;  %v400_v28 = vunpack.c.0.s8 %v381_v25  ;;  %v401_v29 = vunpack.c.1.s8 %v381_v25  ;;  %v402_v30 = vunpack.c.2.s8 %v381_v25  ;;  %v403_v31 = vunpack.c.3.s8 %v381_v25 }
  0x93   :  { %vm277_vm15 = vcmp.lt.s32.totalorder %v865_v5, %v105_v26  ;;  %vm276_vm0 = vcmp.lt.s32.totalorder %v865_v5, %v102_v27 }
  0x94   :  { %v468_v32 = vpack.c.b16 %v400_v28, %v400_v28  ;;  %v470_v33 = vpack.c.b16 %v401_v29, %v401_v29  ;;  %v472_v34 = vpack.c.b16 %v402_v30, %v402_v30  ;;  %v474_v35 = vpack.c.b16 %v403_v31, %v403_v31  ;;  %vm338_vm1 = vmpackc.low %vm277_vm15, %vm276_vm0 }
  0x95   :  { %v111_v36 = vpop.permute.xlu1 %110  ;;  %v108_v37 = vpop.permute.xlu0 %107 }
  0x96   :  { %v469_v38 = vpack.c.b8 %v468_v32, %v468_v32  ;;  %v471_v39 = vpack.c.b8 %v470_v33, %v470_v33  ;;  %v473_v40 = vpack.c.b8 %v472_v34, %v472_v34  ;;  %v475_v41 = vpack.c.b8 %v474_v35, %v474_v35 }
  0x97   :  { %vm279_vm2 = vcmp.lt.s32.totalorder %v865_v5, %v111_v36  ;;  %vm278_vm3 = vcmp.lt.s32.totalorder %v865_v5, %v108_v37 }
  0x98   :  { %593 = vst.msk [vmem:[%s1204_s1 + $0x8] sm:$0x3] %vm588_vm9, %v469_v38  ;;  %594 = vst.msk [vmem:[%s1204_s1 + $0xa] sm:$0x3] %vm588_vm9, %v471_v39 }
  0x99   :  { %595 = vst.msk [vmem:[%s1204_s1 + $0xc] sm:$0x3] %vm588_vm9, %v473_v40  ;;  %596 = vst.msk [vmem:[%s1204_s1 + $0xe] sm:$0x3] %vm588_vm9, %v475_v41  ;;  %v117_v42 = vpop.permute.xlu1 %116  ;;  %v114_v43 = vpop.permute.xlu0 %113 }
  0x9a   :  { %vm339_vm4 = vmpackc.low %vm279_vm2, %vm278_vm3  ;;  %vm281_vm6 = vcmp.lt.s32.totalorder %v865_v5, %v117_v42  ;;  %vm280_vm7 = vcmp.lt.s32.totalorder %v865_v5, %v114_v43 }
  0x9b   :  { %vm340_vm5 = vmpackc.even %vm339_vm4, %vm338_vm1 }
  0x9c   :  { %v382_v44 = vsel %vm340_vm5, 16843009, %v660_v0  ;;  %vm341_vm8 = vmpackc.low %vm281_vm6, %vm280_vm7 }
  0x9d   :  { %v404_v45 = vunpack.c.0.s8 %v382_v44  ;;  %v405_v46 = vunpack.c.1.s8 %v382_v44  ;;  %v406_v47 = vunpack.c.2.s8 %v382_v44  ;;  %v407_v48 = vunpack.c.3.s8 %v382_v44  ;;  %v123_v53 = vpop.permute.xlu1 %122  ;;  %v120_v54 = vpop.permute.xlu0 %119 }
  0x9e   :  { %vm283_vm10 = vcmp.lt.s32.totalorder %v865_v5, %v123_v53  ;;  %vm282_vm11 = vcmp.lt.s32.totalorder %v865_v5, %v120_v54 }
  0x9f   :  { %v476_v49 = vpack.c.b16 %v404_v45, %v404_v45  ;;  %v478_v50 = vpack.c.b16 %v405_v46, %v405_v46  ;;  %v480_v51 = vpack.c.b16 %v406_v47, %v406_v47  ;;  %v482_v52 = vpack.c.b16 %v407_v48, %v407_v48  ;;  %vm342_vm12 = vmpackc.low %vm283_vm10, %vm282_vm11 }
  0xa0   :  { %vm343_vm13 = vmpackc.even %vm342_vm12, %vm341_vm8 }
  0xa1   :  { %v477_v55 = vpack.c.b8 %v476_v49, %v476_v49  ;;  %v479_v56 = vpack.c.b8 %v478_v50, %v478_v50  ;;  %v481_v57 = vpack.c.b8 %v480_v51, %v480_v51  ;;  %v483_v58 = vpack.c.b8 %v482_v52, %v482_v52  ;;  %v129_v60 = vpop.permute.xlu1 %128  ;;  %v126_v61 = vpop.permute.xlu0 %125 }
  0xa2   :  { %v383_v59 = vsel %vm343_vm13, 16843009, %v660_v0  ;;  %vm285_vm14 = vcmp.lt.s32.totalorder %v865_v5, %v129_v60  ;;  %vm284_vm15 = vcmp.lt.s32.totalorder %v865_v5, %v126_v61 }
  0xa3   :  { %597 = vst.msk [vmem:[%s1204_s1 + $0x10] sm:$0x3] %vm588_vm9, %v477_v55  ;;  %598 = vst.msk [vmem:[%s1204_s1 + $0x12] sm:$0x3] %vm588_vm9, %v479_v56  ;;  %v408_v62 = vunpack.c.0.s8 %v383_v59  ;;  %v409_v63 = vunpack.c.1.s8 %v383_v59  ;;  %v410_v1 = vunpack.c.2.s8 %v383_v59  ;;  %v411_v2 = vunpack.c.3.s8 %v383_v59 }
  0xa4   :  { %599 = vst.msk [vmem:[%s1204_s1 + $0x14] sm:$0x3] %vm588_vm9, %v481_v57  ;;  %600 = vst.msk [vmem:[%s1204_s1 + $0x16] sm:$0x3] %vm588_vm9, %v483_v58 }
  0xa5   :  { %v484_v3 = vpack.c.b16 %v408_v62, %v408_v62  ;;  %v486_v4 = vpack.c.b16 %v409_v63, %v409_v63  ;;  %v488_v6 = vpack.c.b16 %v410_v1, %v410_v1  ;;  %v490_v7 = vpack.c.b16 %v411_v2, %v411_v2  ;;  %v135_v8 = vpop.permute.xlu1 %134  ;;  %v132_v9 = vpop.permute.xlu0 %131  ;;  %vm344_vm0 = vmpackc.low %vm285_vm14, %vm284_vm15 }
  0xa6   :  { %vm287_vm1 = vcmp.lt.s32.totalorder %v865_v5, %v135_v8  ;;  %vm286_vm2 = vcmp.lt.s32.totalorder %v865_v5, %v132_v9 }
  0xa7   :  { %v485_v10 = vpack.c.b8 %v484_v3, %v484_v3  ;;  %v487_v11 = vpack.c.b8 %v486_v4, %v486_v4  ;;  %v489_v12 = vpack.c.b8 %v488_v6, %v488_v6  ;;  %v491_v13 = vpack.c.b8 %v490_v7, %v490_v7  ;;  %vm345_vm3 = vmpackc.low %vm287_vm1, %vm286_vm2 }
  0xa8   :  { %vm346_vm4 = vmpackc.even %vm345_vm3, %vm344_vm0 }
  0xa9   :  { %601 = vst.msk [vmem:[%s1204_s1 + $0x18] sm:$0x3] %vm588_vm9, %v485_v10  ;;  %602 = vst.msk [vmem:[%s1204_s1 + $0x1a] sm:$0x3] %vm588_vm9, %v487_v11  ;;  %v141_v14 = vpop.permute.xlu1 %140  ;;  %v138_v15 = vpop.permute.xlu0 %137  ;;  %v384_v16 = vsel %vm346_vm4, 16843009, %v660_v0 }
  0xaa   :  { %603 = vst.msk [vmem:[%s1204_s1 + $0x1c] sm:$0x3] %vm588_vm9, %v489_v12  ;;  %604 = vst.msk [vmem:[%s1204_s1 + $0x1e] sm:$0x3] %vm588_vm9, %v491_v13  ;;  %vm289_vm5 = vcmp.lt.s32.totalorder %v865_v5, %v141_v14  ;;  %vm288_vm6 = vcmp.lt.s32.totalorder %v865_v5, %v138_v15  ;;  %v412_v17 = vunpack.c.0.s8 %v384_v16  ;;  %v413_v18 = vunpack.c.1.s8 %v384_v16 }
  0xab   :  { %v414_v19 = vunpack.c.2.s8 %v384_v16  ;;  %v415_v20 = vunpack.c.3.s8 %v384_v16  ;;  %vm347_vm7 = vmpackc.low %vm289_vm5, %vm288_vm6 }
  0xac   :  { %v492_v21 = vpack.c.b16 %v412_v17, %v412_v17  ;;  %v494_v22 = vpack.c.b16 %v413_v18, %v413_v18 }
  0xad   :  { %v496_v23 = vpack.c.b16 %v414_v19, %v414_v19  ;;  %v498_v24 = vpack.c.b16 %v415_v20, %v415_v20  ;;  %v147_v25 = vpop.permute.xlu1 %146  ;;  %v144_v26 = vpop.permute.xlu0 %143 }
  0xae   :  { %vm291_vm8 = vcmp.lt.s32.totalorder %v865_v5, %v147_v25  ;;  %vm290_vm10 = vcmp.lt.s32.totalorder %v865_v5, %v144_v26  ;;  %v493_v27 = vpack.c.b8 %v492_v21, %v492_v21  ;;  %v495_v28 = vpack.c.b8 %v494_v22, %v494_v22 }
  0xaf   :  { %v497_v29 = vpack.c.b8 %v496_v23, %v496_v23  ;;  %v499_v30 = vpack.c.b8 %v498_v24, %v498_v24  ;;  %vm348_vm11 = vmpackc.low %vm291_vm8, %vm290_vm10 }
  0xb0   :  { %vm349_vm12 = vmpackc.even %vm348_vm11, %vm347_vm7  ;;  %605 = vst.msk [vmem:[%s1204_s1 + $0x20] sm:$0x3] %vm588_vm9, %v493_v27 }
  0xb1   :  { %606 = vst.msk [vmem:[%s1204_s1 + $0x22] sm:$0x3] %vm588_vm9, %v495_v28  ;;  %607 = vst.msk [vmem:[%s1204_s1 + $0x24] sm:$0x3] %vm588_vm9, %v497_v29  ;;  %v385_v31 = vsel %vm349_vm12, 16843009, %v660_v0  ;;  %v153_v32 = vpop.permute.xlu1 %152  ;;  %v150_v33 = vpop.permute.xlu0 %149 }
  0xb2   :  { %608 = vst.msk [vmem:[%s1204_s1 + $0x26] sm:$0x3] %vm588_vm9, %v499_v30  ;;  %v416_v34 = vunpack.c.0.s8 %v385_v31  ;;  %v417_v35 = vunpack.c.1.s8 %v385_v31  ;;  %v418_v36 = vunpack.c.2.s8 %v385_v31  ;;  %v419_v37 = vunpack.c.3.s8 %v385_v31 }
  0xb3   :  { %vm293_vm13 = vcmp.lt.s32.totalorder %v865_v5, %v153_v32  ;;  %vm292_vm14 = vcmp.lt.s32.totalorder %v865_v5, %v150_v33 }
  0xb4   :  { %v500_v38 = vpack.c.b16 %v416_v34, %v416_v34  ;;  %v502_v39 = vpack.c.b16 %v417_v35, %v417_v35  ;;  %v504_v40 = vpack.c.b16 %v418_v36, %v418_v36  ;;  %v506_v41 = vpack.c.b16 %v419_v37, %v419_v37  ;;  %vm350_vm15 = vmpackc.low %vm293_vm13, %vm292_vm14 }
  0xb5   :  { %v159_v42 = vpop.permute.xlu1 %158  ;;  %v156_v43 = vpop.permute.xlu0 %155 }
  0xb6   :  { %v501_v44 = vpack.c.b8 %v500_v38, %v500_v38  ;;  %v503_v45 = vpack.c.b8 %v502_v39, %v502_v39  ;;  %v505_v46 = vpack.c.b8 %v504_v40, %v504_v40  ;;  %v507_v47 = vpack.c.b8 %v506_v41, %v506_v41 }
  0xb7   :  { %vm295_vm0 = vcmp.lt.s32.totalorder %v865_v5, %v159_v42  ;;  %vm294_vm1 = vcmp.lt.s32.totalorder %v865_v5, %v156_v43 }
  0xb8   :  { %609 = vst.msk [vmem:[%s1204_s1 + $0x28] sm:$0x3] %vm588_vm9, %v501_v44  ;;  %610 = vst.msk [vmem:[%s1204_s1 + $0x2a] sm:$0x3] %vm588_vm9, %v503_v45 }
  0xb9   :  { %611 = vst.msk [vmem:[%s1204_s1 + $0x2c] sm:$0x3] %vm588_vm9, %v505_v46  ;;  %612 = vst.msk [vmem:[%s1204_s1 + $0x2e] sm:$0x3] %vm588_vm9, %v507_v47  ;;  %v165_v48 = vpop.permute.xlu1 %164  ;;  %v162_v49 = vpop.permute.xlu0 %161 }
  0xba   :  { %vm351_vm2 = vmpackc.low %vm295_vm0, %vm294_vm1  ;;  %vm297_vm4 = vcmp.lt.s32.totalorder %v865_v5, %v165_v48  ;;  %vm296_vm5 = vcmp.lt.s32.totalorder %v865_v5, %v162_v49 }
  0xbb   :  { %vm352_vm3 = vmpackc.even %vm351_vm2, %vm350_vm15 }
  0xbc   :  { %v386_v50 = vsel %vm352_vm3, 16843009, %v660_v0  ;;  %vm353_vm6 = vmpackc.low %vm297_vm4, %vm296_vm5 }
  0xbd   :  { %v420_v51 = vunpack.c.0.s8 %v386_v50  ;;  %v421_v52 = vunpack.c.1.s8 %v386_v50  ;;  %v422_v53 = vunpack.c.2.s8 %v386_v50  ;;  %v423_v54 = vunpack.c.3.s8 %v386_v50  ;;  %v171_v59 = vpop.permute.xlu1 %170  ;;  %v168_v60 = vpop.permute.xlu0 %167 }
  0xbe   :  { %vm299_vm7 = vcmp.lt.s32.totalorder %v865_v5, %v171_v59  ;;  %vm298_vm8 = vcmp.lt.s32.totalorder %v865_v5, %v168_v60 }
  0xbf   :  { %v508_v55 = vpack.c.b16 %v420_v51, %v420_v51  ;;  %v510_v56 = vpack.c.b16 %v421_v52, %v421_v52  ;;  %v512_v57 = vpack.c.b16 %v422_v53, %v422_v53  ;;  %v514_v58 = vpack.c.b16 %v423_v54, %v423_v54  ;;  %vm354_vm10 = vmpackc.low %vm299_vm7, %vm298_vm8 }
  0xc0   :  { %vm355_vm11 = vmpackc.even %vm354_vm10, %vm353_vm6 }
  0xc1   :  { %v509_v61 = vpack.c.b8 %v508_v55, %v508_v55  ;;  %v511_v62 = vpack.c.b8 %v510_v56, %v510_v56  ;;  %v513_v63 = vpack.c.b8 %v512_v57, %v512_v57  ;;  %v515_v1 = vpack.c.b8 %v514_v58, %v514_v58  ;;  %v177_v3 = vpop.permute.xlu1 %176  ;;  %v174_v4 = vpop.permute.xlu0 %173 }
  0xc2   :  { %v387_v2 = vsel %vm355_vm11, 16843009, %v660_v0  ;;  %vm301_vm12 = vcmp.lt.s32.totalorder %v865_v5, %v177_v3  ;;  %vm300_vm13 = vcmp.lt.s32.totalorder %v865_v5, %v174_v4 }
  0xc3   :  { %613 = vst.msk [vmem:[%s1204_s1 + $0x30] sm:$0x3] %vm588_vm9, %v509_v61  ;;  %614 = vst.msk [vmem:[%s1204_s1 + $0x32] sm:$0x3] %vm588_vm9, %v511_v62  ;;  %v424_v6 = vunpack.c.0.s8 %v387_v2  ;;  %v425_v7 = vunpack.c.1.s8 %v387_v2  ;;  %v426_v8 = vunpack.c.2.s8 %v387_v2  ;;  %v427_v9 = vunpack.c.3.s8 %v387_v2 }
  0xc4   :  { %615 = vst.msk [vmem:[%s1204_s1 + $0x34] sm:$0x3] %vm588_vm9, %v513_v63  ;;  %616 = vst.msk [vmem:[%s1204_s1 + $0x36] sm:$0x3] %vm588_vm9, %v515_v1 }
  0xc5   :  { %v516_v10 = vpack.c.b16 %v424_v6, %v424_v6  ;;  %v518_v11 = vpack.c.b16 %v425_v7, %v425_v7  ;;  %v520_v12 = vpack.c.b16 %v426_v8, %v426_v8  ;;  %v522_v13 = vpack.c.b16 %v427_v9, %v427_v9  ;;  %v183_v14 = vpop.permute.xlu1 %182  ;;  %v180_v15 = vpop.permute.xlu0 %179  ;;  %vm356_vm14 = vmpackc.low %vm301_vm12, %vm300_vm13 }
  0xc6   :  { %vm303_vm15 = vcmp.lt.s32.totalorder %v865_v5, %v183_v14  ;;  %vm302_vm0 = vcmp.lt.s32.totalorder %v865_v5, %v180_v15 }
  0xc7   :  { %v517_v16 = vpack.c.b8 %v516_v10, %v516_v10  ;;  %v519_v17 = vpack.c.b8 %v518_v11, %v518_v11  ;;  %v521_v18 = vpack.c.b8 %v520_v12, %v520_v12  ;;  %v523_v19 = vpack.c.b8 %v522_v13, %v522_v13  ;;  %vm357_vm1 = vmpackc.low %vm303_vm15, %vm302_vm0 }
  0xc8   :  { %vm358_vm2 = vmpackc.even %vm357_vm1, %vm356_vm14 }
  0xc9   :  { %617 = vst.msk [vmem:[%s1204_s1 + $0x38] sm:$0x3] %vm588_vm9, %v517_v16  ;;  %618 = vst.msk [vmem:[%s1204_s1 + $0x3a] sm:$0x3] %vm588_vm9, %v519_v17  ;;  %v189_v20 = vpop.permute.xlu1 %188  ;;  %v186_v21 = vpop.permute.xlu0 %185  ;;  %v388_v22 = vsel %vm358_vm2, 16843009, %v660_v0 }
  0xca   :  { %619 = vst.msk [vmem:[%s1204_s1 + $0x3c] sm:$0x3] %vm588_vm9, %v521_v18  ;;  %620 = vst.msk [vmem:[%s1204_s1 + $0x3e] sm:$0x3] %vm588_vm9, %v523_v19  ;;  %vm305_vm3 = vcmp.lt.s32.totalorder %v865_v5, %v189_v20  ;;  %vm304_vm4 = vcmp.lt.s32.totalorder %v865_v5, %v186_v21  ;;  %v428_v23 = vunpack.c.0.s8 %v388_v22  ;;  %v429_v24 = vunpack.c.1.s8 %v388_v22 }
  0xcb   :  { %v430_v25 = vunpack.c.2.s8 %v388_v22  ;;  %v431_v26 = vunpack.c.3.s8 %v388_v22  ;;  %vm359_vm5 = vmpackc.low %vm305_vm3, %vm304_vm4 }
  0xcc   :  { %v524_v27 = vpack.c.b16 %v428_v23, %v428_v23  ;;  %v526_v28 = vpack.c.b16 %v429_v24, %v429_v24 }
  0xcd   :  { %v528_v29 = vpack.c.b16 %v430_v25, %v430_v25  ;;  %v530_v30 = vpack.c.b16 %v431_v26, %v431_v26  ;;  %v195_v31 = vpop.permute.xlu1 %194  ;;  %v192_v32 = vpop.permute.xlu0 %191 }
  0xce   :  { %vm307_vm6 = vcmp.lt.s32.totalorder %v865_v5, %v195_v31  ;;  %vm306_vm7 = vcmp.lt.s32.totalorder %v865_v5, %v192_v32  ;;  %v525_v33 = vpack.c.b8 %v524_v27, %v524_v27  ;;  %v527_v34 = vpack.c.b8 %v526_v28, %v526_v28 }
  0xcf   :  { %v529_v35 = vpack.c.b8 %v528_v29, %v528_v29  ;;  %v531_v36 = vpack.c.b8 %v530_v30, %v530_v30  ;;  %vm360_vm8 = vmpackc.low %vm307_vm6, %vm306_vm7 }
  0xd0   :  { %vm361_vm10 = vmpackc.even %vm360_vm8, %vm359_vm5  ;;  %621 = vst.msk [vmem:[%s1204_s1 + $0x40] sm:$0x3] %vm588_vm9, %v525_v33 }
  0xd1   :  { %622 = vst.msk [vmem:[%s1204_s1 + $0x42] sm:$0x3] %vm588_vm9, %v527_v34  ;;  %623 = vst.msk [vmem:[%s1204_s1 + $0x44] sm:$0x3] %vm588_vm9, %v529_v35  ;;  %v389_v37 = vsel %vm361_vm10, 16843009, %v660_v0  ;;  %v201_v38 = vpop.permute.xlu1 %200  ;;  %v198_v39 = vpop.permute.xlu0 %197 }
  0xd2   :  { %624 = vst.msk [vmem:[%s1204_s1 + $0x46] sm:$0x3] %vm588_vm9, %v531_v36  ;;  %v432_v40 = vunpack.c.0.s8 %v389_v37  ;;  %v433_v41 = vunpack.c.1.s8 %v389_v37  ;;  %v434_v42 = vunpack.c.2.s8 %v389_v37  ;;  %v435_v43 = vunpack.c.3.s8 %v389_v37 }
  0xd3   :  { %vm309_vm11 = vcmp.lt.s32.totalorder %v865_v5, %v201_v38  ;;  %vm308_vm12 = vcmp.lt.s32.totalorder %v865_v5, %v198_v39 }
  0xd4   :  { %v532_v44 = vpack.c.b16 %v432_v40, %v432_v40  ;;  %v534_v45 = vpack.c.b16 %v433_v41, %v433_v41  ;;  %v536_v46 = vpack.c.b16 %v434_v42, %v434_v42  ;;  %v538_v47 = vpack.c.b16 %v435_v43, %v435_v43  ;;  %vm362_vm13 = vmpackc.low %vm309_vm11, %vm308_vm12 }
  0xd5   :  { %v207_v48 = vpop.permute.xlu1 %206  ;;  %v204_v49 = vpop.permute.xlu0 %203 }
  0xd6   :  { %v533_v50 = vpack.c.b8 %v532_v44, %v532_v44  ;;  %v535_v51 = vpack.c.b8 %v534_v45, %v534_v45  ;;  %v537_v52 = vpack.c.b8 %v536_v46, %v536_v46  ;;  %v539_v53 = vpack.c.b8 %v538_v47, %v538_v47 }
  0xd7   :  { %vm311_vm14 = vcmp.lt.s32.totalorder %v865_v5, %v207_v48  ;;  %vm310_vm15 = vcmp.lt.s32.totalorder %v865_v5, %v204_v49 }
  0xd8   :  { %625 = vst.msk [vmem:[%s1204_s1 + $0x48] sm:$0x3] %vm588_vm9, %v533_v50  ;;  %626 = vst.msk [vmem:[%s1204_s1 + $0x4a] sm:$0x3] %vm588_vm9, %v535_v51 }
  0xd9   :  { %627 = vst.msk [vmem:[%s1204_s1 + $0x4c] sm:$0x3] %vm588_vm9, %v537_v52  ;;  %628 = vst.msk [vmem:[%s1204_s1 + $0x4e] sm:$0x3] %vm588_vm9, %v539_v53  ;;  %v213_v54 = vpop.permute.xlu1 %212  ;;  %v210_v55 = vpop.permute.xlu0 %209 }
  0xda   :  { %vm363_vm0 = vmpackc.low %vm311_vm14, %vm310_vm15  ;;  %vm313_vm2 = vcmp.lt.s32.totalorder %v865_v5, %v213_v54  ;;  %vm312_vm3 = vcmp.lt.s32.totalorder %v865_v5, %v210_v55 }
  0xdb   :  { %vm364_vm1 = vmpackc.even %vm363_vm0, %vm362_vm13 }
  0xdc   :  { %v390_v56 = vsel %vm364_vm1, 16843009, %v660_v0  ;;  %vm365_vm4 = vmpackc.low %vm313_vm2, %vm312_vm3 }
  0xdd   :  { %v436_v57 = vunpack.c.0.s8 %v390_v56  ;;  %v437_v58 = vunpack.c.1.s8 %v390_v56  ;;  %v438_v59 = vunpack.c.2.s8 %v390_v56  ;;  %v439_v60 = vunpack.c.3.s8 %v390_v56  ;;  %v219_v2 = vpop.permute.xlu1 %218  ;;  %v216_v3 = vpop.permute.xlu0 %215 }
  0xde   :  { %vm315_vm5 = vcmp.lt.s32.totalorder %v865_v5, %v219_v2  ;;  %vm314_vm6 = vcmp.lt.s32.totalorder %v865_v5, %v216_v3 }
  0xdf   :  { %v540_v61 = vpack.c.b16 %v436_v57, %v436_v57  ;;  %v542_v62 = vpack.c.b16 %v437_v58, %v437_v58  ;;  %v544_v63 = vpack.c.b16 %v438_v59, %v438_v59  ;;  %v546_v1 = vpack.c.b16 %v439_v60, %v439_v60  ;;  %vm366_vm7 = vmpackc.low %vm315_vm5, %vm314_vm6 }
  0xe0   :  { %vm367_vm8 = vmpackc.even %vm366_vm7, %vm365_vm4 }
  0xe1   :  { %v541_v4 = vpack.c.b8 %v540_v61, %v540_v61  ;;  %v543_v6 = vpack.c.b8 %v542_v62, %v542_v62  ;;  %v545_v7 = vpack.c.b8 %v544_v63, %v544_v63  ;;  %v547_v8 = vpack.c.b8 %v546_v1, %v546_v1  ;;  %v225_v10 = vpop.permute.xlu1 %224  ;;  %v222_v11 = vpop.permute.xlu0 %221 }
  0xe2   :  { %v391_v9 = vsel %vm367_vm8, 16843009, %v660_v0  ;;  %vm317_vm10 = vcmp.lt.s32.totalorder %v865_v5, %v225_v10  ;;  %vm316_vm11 = vcmp.lt.s32.totalorder %v865_v5, %v222_v11 }
  0xe3   :  { %629 = vst.msk [vmem:[%s1204_s1 + $0x50] sm:$0x3] %vm588_vm9, %v541_v4  ;;  %630 = vst.msk [vmem:[%s1204_s1 + $0x52] sm:$0x3] %vm588_vm9, %v543_v6  ;;  %v440_v12 = vunpack.c.0.s8 %v391_v9  ;;  %v441_v13 = vunpack.c.1.s8 %v391_v9  ;;  %v442_v14 = vunpack.c.2.s8 %v391_v9  ;;  %v443_v15 = vunpack.c.3.s8 %v391_v9 }
  0xe4   :  { %631 = vst.msk [vmem:[%s1204_s1 + $0x54] sm:$0x3] %vm588_vm9, %v545_v7  ;;  %632 = vst.msk [vmem:[%s1204_s1 + $0x56] sm:$0x3] %vm588_vm9, %v547_v8 }
  0xe5   :  { %v548_v16 = vpack.c.b16 %v440_v12, %v440_v12  ;;  %v550_v17 = vpack.c.b16 %v441_v13, %v441_v13  ;;  %v552_v18 = vpack.c.b16 %v442_v14, %v442_v14  ;;  %v554_v19 = vpack.c.b16 %v443_v15, %v443_v15  ;;  %v231_v20 = vpop.permute.xlu1 %230  ;;  %v228_v21 = vpop.permute.xlu0 %227  ;;  %vm368_vm12 = vmpackc.low %vm317_vm10, %vm316_vm11 }
  0xe6   :  { %vm319_vm13 = vcmp.lt.s32.totalorder %v865_v5, %v231_v20  ;;  %vm318_vm14 = vcmp.lt.s32.totalorder %v865_v5, %v228_v21 }
  0xe7   :  { %v549_v22 = vpack.c.b8 %v548_v16, %v548_v16  ;;  %v551_v23 = vpack.c.b8 %v550_v17, %v550_v17  ;;  %v553_v24 = vpack.c.b8 %v552_v18, %v552_v18  ;;  %v555_v25 = vpack.c.b8 %v554_v19, %v554_v19  ;;  %vm369_vm15 = vmpackc.low %vm319_vm13, %vm318_vm14 }
  0xe8   :  { %vm370_vm0 = vmpackc.even %vm369_vm15, %vm368_vm12 }
  0xe9   :  { %633 = vst.msk [vmem:[%s1204_s1 + $0x58] sm:$0x3] %vm588_vm9, %v549_v22  ;;  %634 = vst.msk [vmem:[%s1204_s1 + $0x5a] sm:$0x3] %vm588_vm9, %v551_v23  ;;  %v237_v26 = vpop.permute.xlu1 %236  ;;  %v234_v27 = vpop.permute.xlu0 %233  ;;  %v392_v28 = vsel %vm370_vm0, 16843009, %v660_v0 }
  0xea   :  { %635 = vst.msk [vmem:[%s1204_s1 + $0x5c] sm:$0x3] %vm588_vm9, %v553_v24  ;;  %636 = vst.msk [vmem:[%s1204_s1 + $0x5e] sm:$0x3] %vm588_vm9, %v555_v25  ;;  %vm321_vm1 = vcmp.lt.s32.totalorder %v865_v5, %v237_v26  ;;  %vm320_vm2 = vcmp.lt.s32.totalorder %v865_v5, %v234_v27  ;;  %v444_v29 = vunpack.c.0.s8 %v392_v28  ;;  %v445_v30 = vunpack.c.1.s8 %v392_v28 }
  0xeb   :  { %v446_v31 = vunpack.c.2.s8 %v392_v28  ;;  %v447_v32 = vunpack.c.3.s8 %v392_v28  ;;  %vm371_vm3 = vmpackc.low %vm321_vm1, %vm320_vm2 }
  0xec   :  { %v556_v33 = vpack.c.b16 %v444_v29, %v444_v29  ;;  %v558_v34 = vpack.c.b16 %v445_v30, %v445_v30 }
  0xed   :  { %v560_v35 = vpack.c.b16 %v446_v31, %v446_v31  ;;  %v562_v36 = vpack.c.b16 %v447_v32, %v447_v32  ;;  %v243_v37 = vpop.permute.xlu1 %242  ;;  %v240_v38 = vpop.permute.xlu0 %239 }
  0xee   :  { %vm323_vm4 = vcmp.lt.s32.totalorder %v865_v5, %v243_v37  ;;  %vm322_vm5 = vcmp.lt.s32.totalorder %v865_v5, %v240_v38  ;;  %v557_v39 = vpack.c.b8 %v556_v33, %v556_v33  ;;  %v559_v40 = vpack.c.b8 %v558_v34, %v558_v34 }
  0xef   :  { %v561_v41 = vpack.c.b8 %v560_v35, %v560_v35  ;;  %v563_v42 = vpack.c.b8 %v562_v36, %v562_v36  ;;  %vm372_vm6 = vmpackc.low %vm323_vm4, %vm322_vm5 }
  0xf0   :  { %vm373_vm7 = vmpackc.even %vm372_vm6, %vm371_vm3  ;;  %637 = vst.msk [vmem:[%s1204_s1 + $0x60] sm:$0x3] %vm588_vm9, %v557_v39 }
  0xf1   :  { %638 = vst.msk [vmem:[%s1204_s1 + $0x62] sm:$0x3] %vm588_vm9, %v559_v40  ;;  %639 = vst.msk [vmem:[%s1204_s1 + $0x64] sm:$0x3] %vm588_vm9, %v561_v41  ;;  %v393_v43 = vsel %vm373_vm7, 16843009, %v660_v0  ;;  %v249_v44 = vpop.permute.xlu1 %248  ;;  %v246_v45 = vpop.permute.xlu0 %245 }
  0xf2   :  { %640 = vst.msk [vmem:[%s1204_s1 + $0x66] sm:$0x3] %vm588_vm9, %v563_v42  ;;  %v448_v46 = vunpack.c.0.s8 %v393_v43  ;;  %v449_v47 = vunpack.c.1.s8 %v393_v43  ;;  %v450_v48 = vunpack.c.2.s8 %v393_v43  ;;  %v451_v49 = vunpack.c.3.s8 %v393_v43 }
  0xf3   :  { %vm325_vm8 = vcmp.lt.s32.totalorder %v865_v5, %v249_v44  ;;  %vm324_vm10 = vcmp.lt.s32.totalorder %v865_v5, %v246_v45 }
  0xf4   :  { %v564_v50 = vpack.c.b16 %v448_v46, %v448_v46  ;;  %v566_v51 = vpack.c.b16 %v449_v47, %v449_v47  ;;  %v568_v52 = vpack.c.b16 %v450_v48, %v450_v48  ;;  %v570_v53 = vpack.c.b16 %v451_v49, %v451_v49  ;;  %vm374_vm11 = vmpackc.low %vm325_vm8, %vm324_vm10 }
  0xf5   :  { %v255_v54 = vpop.permute.xlu1 %254  ;;  %v252_v55 = vpop.permute.xlu0 %251 }
  0xf6   :  { %v565_v56 = vpack.c.b8 %v564_v50, %v564_v50  ;;  %v567_v57 = vpack.c.b8 %v566_v51, %v566_v51  ;;  %v569_v58 = vpack.c.b8 %v568_v52, %v568_v52  ;;  %v571_v59 = vpack.c.b8 %v570_v53, %v570_v53 }
  0xf7   :  { %vm327_vm12 = vcmp.lt.s32.totalorder %v865_v5, %v255_v54  ;;  %vm326_vm13 = vcmp.lt.s32.totalorder %v865_v5, %v252_v55 }
  0xf8   :  { %641 = vst.msk [vmem:[%s1204_s1 + $0x68] sm:$0x3] %vm588_vm9, %v565_v56  ;;  %642 = vst.msk [vmem:[%s1204_s1 + $0x6a] sm:$0x3] %vm588_vm9, %v567_v57 }
  0xf9   :  { %643 = vst.msk [vmem:[%s1204_s1 + $0x6c] sm:$0x3] %vm588_vm9, %v569_v58  ;;  %644 = vst.msk [vmem:[%s1204_s1 + $0x6e] sm:$0x3] %vm588_vm9, %v571_v59  ;;  %v261_v60 = vpop.permute.xlu1 %260  ;;  %v258_v61 = vpop.permute.xlu0 %257 }
  0xfa   :  { %vm375_vm14 = vmpackc.low %vm327_vm12, %vm326_vm13  ;;  %vm329_vm0 = vcmp.lt.s32.totalorder %v865_v5, %v261_v60  ;;  %vm328_vm1 = vcmp.lt.s32.totalorder %v865_v5, %v258_v61 }
  0xfb   :  { %vm376_vm15 = vmpackc.even %vm375_vm14, %vm374_vm11 }
  0xfc   :  { %v394_v62 = vsel %vm376_vm15, 16843009, %v660_v0  ;;  %vm377_vm2 = vmpackc.low %vm329_vm0, %vm328_vm1 }
  0xfd   :  { %v452_v63 = vunpack.c.0.s8 %v394_v62  ;;  %v453_v1 = vunpack.c.1.s8 %v394_v62  ;;  %v454_v2 = vunpack.c.2.s8 %v394_v62  ;;  %v455_v3 = vunpack.c.3.s8 %v394_v62  ;;  %v267_v9 = vpop.permute.xlu1 %266  ;;  %v264_v10 = vpop.permute.xlu0 %263 }
  0xfe   :  { %vm331_vm3 = vcmp.lt.s32.totalorder %v865_v5, %v267_v9  ;;  %vm330_vm4 = vcmp.lt.s32.totalorder %v865_v5, %v264_v10 }
  0xff   :  { %v572_v4 = vpack.c.b16 %v452_v63, %v452_v63  ;;  %v574_v6 = vpack.c.b16 %v453_v1, %v453_v1  ;;  %v576_v7 = vpack.c.b16 %v454_v2, %v454_v2  ;;  %v578_v8 = vpack.c.b16 %v455_v3, %v455_v3  ;;  %vm378_vm5 = vmpackc.low %vm331_vm3, %vm330_vm4 }
 0x100   :  { %vm379_vm6 = vmpackc.even %vm378_vm5, %vm377_vm2 }
 0x101   :  { %v573_v11 = vpack.c.b8 %v572_v4, %v572_v4  ;;  %v575_v12 = vpack.c.b8 %v574_v6, %v574_v6  ;;  %v577_v13 = vpack.c.b8 %v576_v7, %v576_v7  ;;  %v579_v14 = vpack.c.b8 %v578_v8, %v578_v8 }
 0x102   :  { %v395_v5 = vsel %vm379_vm6, 16843009, %v660_v0 }
 0x103   :  { %645 = vst.msk [vmem:[%s1204_s1 + $0x70] sm:$0x3] %vm588_vm9, %v573_v11  ;;  %646 = vst.msk [vmem:[%s1204_s1 + $0x72] sm:$0x3] %vm588_vm9, %v575_v12  ;;  %v456_v15 = vunpack.c.0.s8 %v395_v5  ;;  %v457_v16 = vunpack.c.1.s8 %v395_v5  ;;  %v458_v17 = vunpack.c.2.s8 %v395_v5  ;;  %v459_v18 = vunpack.c.3.s8 %v395_v5 }
 0x104   :  { %647 = vst.msk [vmem:[%s1204_s1 + $0x74] sm:$0x3] %vm588_vm9, %v577_v13  ;;  %648 = vst.msk [vmem:[%s1204_s1 + $0x76] sm:$0x3] %vm588_vm9, %v579_v14 }
 0x105   :  { %v580_v19 = vpack.c.b16 %v456_v15, %v456_v15  ;;  %v582_v20 = vpack.c.b16 %v457_v16, %v457_v16  ;;  %v584_v21 = vpack.c.b16 %v458_v17, %v458_v17  ;;  %v586_v22 = vpack.c.b16 %v459_v18, %v459_v18 }
 0x107   :  { %v581_v23 = vpack.c.b8 %v580_v19, %v580_v19  ;;  %v583_v24 = vpack.c.b8 %v582_v20, %v582_v20  ;;  %v585_v25 = vpack.c.b8 %v584_v21, %v584_v21  ;;  %v587_v26 = vpack.c.b8 %v586_v22, %v586_v22 }
 0x109   :  { %649 = vst.msk [vmem:[%s1204_s1 + $0x78] sm:$0x3] %vm588_vm9, %v581_v23  ;;  %650 = vst.msk [vmem:[%s1204_s1 + $0x7a] sm:$0x3] %vm588_vm9, %v583_v24 }
 0x10a   :  { %651 = vst.msk [vmem:[%s1204_s1 + $0x7c] sm:$0x3] %vm588_vm9, %v585_v25  ;;  %652 = vst.msk [vmem:[%s1204_s1 + $0x7e] sm:$0x3] %vm588_vm9, %v587_v26 }

</bundles_post_ra>
